<compile_context>
chip_gen: v7x
topology: tpu7x:2x2x1
jax: 0.10.0
libtpu: 0.0.40
codegen_flags: <defaults>
</compile_context>

<pallas_src>
import functools

import jax
import jax.numpy as jnp
import numpy as np
from jax.experimental import pallas as pl
from jax.experimental.pallas import tpu as pltpu


def _gauss3d_kernel(x_ref, g_ref, o_ref):
    # x_ref: (TM, 3)  pre-scaled distance vectors (rows) for this tile
    # g_ref: (3, G3)  pre-scaled grid coordinates (x, y, z rows), resident
    # o_ref: (TM, G3) gaussians = exp(-||sg - sx||^2)
    x = x_ref[...]                       # (TM, 3)
    g = g_ref[...]                       # (3, G3)

    d = g[0:1, :] - x[:, 0:1]            # (TM, G3)
    d2 = d * d
    d = g[1:2, :] - x[:, 1:2]
    d2 = d2 + d * d
    d = g[2:3, :] - x[:, 2:3]
    d2 = d2 + d * d
    o_ref[...] = jnp.exp(-d2)


def _round_up(n, m):
    return ((n + m - 1) // m) * m


@functools.partial(jax.jit, static_argnames=("grid_length", "grid_size"))
def gaussian_smearing_3d_pallas(distance_vector, *, grid_length=10.0, grid_size=20):
    """distance_vector: (B, A, N, 3) float32 -> (B, A, N, G, G, G) float32."""
    B, A, N, three = distance_vector.shape
    assert three == 3
    G = grid_size
    G3 = G * G * G
    dtype = jnp.float32

    # ---- parameter / buffer construction (mirrors the PyTorch module) -------
    half = grid_length / 2.0
    offsets = jnp.linspace(-half, half, G, dtype=dtype)                  # (G,)
    gx, gy, gz = jnp.meshgrid(offsets, offsets, offsets, indexing="ij")  # (G,G,G)
    grid = jnp.stack([gx, gy, gz], axis=-1)                              # (G,G,G,3)
    delta = offsets[1] - offsets[0]

    # widths == delta everywhere -> widths.mean(-1) == delta and
    # coeff = -0.5 / delta^2 is a single scalar.  Fold it into a pre-scale of
    # both grid and x:  coeff * ||g - x||^2 == -||s*g - s*x||^2, s = sqrt(.5)/delta.
    scale = jnp.sqrt(jnp.asarray(0.5, dtype)) / delta

    grid_flat = (grid.reshape(G3, 3).T * scale).astype(dtype)            # (3, G3)

    # ---- row tiling ----------------------------------------------------------
    # Largest TM (<=512, multiple of 8) such that the double-buffered output
    # block 2*TM*G3*4B stays within ~20 MiB; tiny inputs collapse to a single
    # block so no row padding / slicing is needed at all.
    M = B * A * N
    OUT_BUDGET = 20 * 1024 * 1024
    tm_cap = max(8, (OUT_BUDGET // (2 * G3 * 4)) // 8 * 8)
    TM = int(min(512, tm_cap))
    if M <= TM:
        TM = max(8, _round_up(M, 8))
    Mp = _round_up(M, TM)

    x_flat = distance_vector.reshape(M, 3).astype(dtype) * scale         # (M, 3)
    if Mp != M:
        x_flat = jnp.zeros((Mp, 3), dtype).at[:M].set(x_flat)

    # ---- Pallas call: hot path (diff, square-accumulate, exp) ----------------
    out = pl.pallas_call(
        _gauss3d_kernel,
        out_shape=jax.ShapeDtypeStruct((Mp, G3), dtype),
        grid_spec=pltpu.PrefetchScalarGridSpec(
            num_scalar_prefetch=0,
            grid=(Mp // TM,),
            in_specs=[
                pl.BlockSpec((TM, 3), lambda i: (i, 0)),   # per-step row tile
                pl.BlockSpec((3, G3), lambda i: (0, 0)),   # resident grid
            ],
            # Full-G3 (lane-dense) output block: no lane padding, no slab slice.
            out_specs=pl.BlockSpec((TM, G3), lambda i: (i, 0)),
        ),
        compiler_params=pltpu.CompilerParams(
            dimension_semantics=("parallel",),
            vmem_limit_bytes=48 * 1024 * 1024,
        ),
    )(x_flat, grid_flat)

    if Mp != M:
        out = out[:M]                      # row-only slice, only if padded
    return out.reshape(B, A, N, G, G, G)


def _reference(distance_vector, grid_length=10.0, grid_size=20):
    """Pure-JAX reference mirroring the PyTorch code exactly."""
    G = grid_size
    half = grid_length / 2.0
    offsets = jnp.linspace(-half, half, G, dtype=jnp.float32)
    gx, gy, gz = jnp.meshgrid(offsets, offsets, offsets, indexing="ij")
    grid = jnp.stack([gx, gy, gz], axis=-1)
    widths = (offsets[1] - offsets[0]) * jnp.ones_like(grid)

    diff = grid[None, None, None] - distance_vector[:, :, :, None, None, None, :]
    diff = jnp.linalg.norm(diff, ord=2, axis=-1)
    widths_m = jnp.mean(widths, axis=-1)
    coeff = -0.5 / jnp.power(widths_m, 2)
    return jnp.exp(coeff * jnp.power(diff, 2))


if __name__ == "__main__":
    key = jax.random.PRNGKey(0)
    B, A, N = 2, 3, 4
    grid_length = 10.0
    grid_size = 8  # small G -> G^3 = 512 grid points

    dv = jax.random.normal(key, (B, A, N, 3), dtype=jnp.float32) * 3.0

    out = gaussian_smearing_3d_pallas(
        dv, grid_length=grid_length, grid_size=grid_size
    )
    out = jax.block_until_ready(out)

    ref = _reference(dv, grid_length=grid_length, grid_size=grid_size)
    assert out.shape == (B, A, N, grid_size, grid_size, grid_size)
    np.testing.assert_allclose(np.asarray(out), np.asarray(ref), rtol=1e-5, atol=1e-5)

    print("KERNEL_OK")
</pallas_src>

<mosaic_0001>
module attributes {stable_mosaic.version = 11 : i64} {
  func.func @_gauss3d_kernel(%arg0: i32, %arg1: memref<24x3xf32, #tpu.memory_space<vmem>>, %arg2: memref<3x512xf32, #tpu.memory_space<vmem>>, %arg3: memref<24x512xf32, #tpu.memory_space<vmem>>) attributes {dimension_semantics = [#tpu.dimension_semantics<parallel>], iteration_bounds = array<i64: 1>, scalar_prefetch = 0 : i64, scratch_operands = 0 : i64, tpu.core_type = #tpu.core_type<tc>, window_params = [{transform_indices = @transform_0, window_bounds = array<i64: 24, 3>}, {pipeline_mode = #tpu.pipeline_mode<synchronous>, transform_indices = @transform_1, window_bounds = array<i64: 3, 512>}, {transform_indices = @transform_2, window_bounds = array<i64: 24, 512>}]} {
    %c0 = arith.constant 0 : index
    %c0_0 = arith.constant 0 : index
    %0 = vector.load %arg1[%c0, %c0_0] : memref<24x3xf32, #tpu.memory_space<vmem>>, vector<24x3xf32>
    %c0_1 = arith.constant 0 : index
    %c0_2 = arith.constant 0 : index
    %1 = vector.load %arg2[%c0_1, %c0_2] : memref<3x512xf32, #tpu.memory_space<vmem>>, vector<3x512xf32>
    %2 = vector.extract_strided_slice %1 {offsets = [0, 0], sizes = [1, 512], strides = [1, 1]} : vector<3x512xf32> to vector<1x512xf32>
    %3 = vector.extract_strided_slice %0 {offsets = [0, 0], sizes = [24, 1], strides = [1, 1]} : vector<24x3xf32> to vector<24x1xf32>
    %4 = vector.broadcast %2 : vector<1x512xf32> to vector<24x512xf32>
    %5 = vector.broadcast %3 : vector<24x1xf32> to vector<24x512xf32>
    %6 = arith.subf %4, %5 : vector<24x512xf32>
    %7 = arith.mulf %6, %6 : vector<24x512xf32>
    %8 = vector.extract_strided_slice %1 {offsets = [1, 0], sizes = [1, 512], strides = [1, 1]} : vector<3x512xf32> to vector<1x512xf32>
    %9 = vector.extract_strided_slice %0 {offsets = [0, 1], sizes = [24, 1], strides = [1, 1]} : vector<24x3xf32> to vector<24x1xf32>
    %10 = vector.broadcast %8 : vector<1x512xf32> to vector<24x512xf32>
    %11 = vector.broadcast %9 : vector<24x1xf32> to vector<24x512xf32>
    %12 = arith.subf %10, %11 : vector<24x512xf32>
    %13 = arith.mulf %12, %12 : vector<24x512xf32>
    %14 = arith.addf %7, %13 : vector<24x512xf32>
    %15 = vector.extract_strided_slice %1 {offsets = [2, 0], sizes = [1, 512], strides = [1, 1]} : vector<3x512xf32> to vector<1x512xf32>
    %16 = vector.extract_strided_slice %0 {offsets = [0, 2], sizes = [24, 1], strides = [1, 1]} : vector<24x3xf32> to vector<24x1xf32>
    %17 = vector.broadcast %15 : vector<1x512xf32> to vector<24x512xf32>
    %18 = vector.broadcast %16 : vector<24x1xf32> to vector<24x512xf32>
    %19 = arith.subf %17, %18 : vector<24x512xf32>
    %20 = arith.mulf %19, %19 : vector<24x512xf32>
    %21 = arith.addf %14, %20 : vector<24x512xf32>
    %cst = arith.constant 0.000000e+00 : f32
    %22 = vector.broadcast %cst : f32 to vector<24x512xf32>
    %23 = arith.subf %22, %21 : vector<24x512xf32>
    %24 = math.exp %23 : vector<24x512xf32>
    %c0_3 = arith.constant 0 : index
    %c0_4 = arith.constant 0 : index
    %25 = vector.load %arg3[%c0_3, %c0_4] : memref<24x512xf32, #tpu.memory_space<vmem>>, vector<24x512xf32>
    tpu.vector_store %arg3[%c0_3, %c0_4], %24 {strides = array<i32>} : memref<24x512xf32, #tpu.memory_space<vmem>>, vector<24x512xf32>,
    return
  }
  func.func @transform_0(%arg0: i32) -> (i32, i32) {
    %c0_i32 = arith.constant 0 : i32
    %c0_i32_0 = arith.constant 0 : i32
    return %arg0, %c0_i32 : i32, i32
  }
  func.func @transform_1(%arg0: i32) -> (i32, i32) {
    %c0_i32 = arith.constant 0 : i32
    %c0_i32_0 = arith.constant 0 : i32
    %c0_i32_1 = arith.constant 0 : i32
    return %c0_i32, %c0_i32_0 : i32, i32
  }
  func.func @transform_2(%arg0: i32) -> (i32, i32) {
    %c0_i32 = arith.constant 0 : i32
    %c0_i32_0 = arith.constant 0 : i32
    return %arg0, %c0_i32 : i32, i32
  }
}

</mosaic_0001>

<bundles_post_ra>
// kernel: gaussian_smearing_3d_pallas.1
= control target key start
LH: loop header
LB: loop body
LE: loop exit
PB: predicated region body
PF: predicated region fallthrough
CT: control target
= control target key end

     0   :  { %v346_v0 = vmov 0   ;;  %v347_v4 = vmov 1   ;;  %v348_v5 = vmov 2   ;;  %v18_v6 = vlaneseq  ;;  %s447_s0 = inlined_call_operand.vmem [shape: f32[24,3], index: 0, kind: input, shape index: {}]   ;;  %s448_s1 = inlined_call_operand.vmem [shape: f32[3,512], index: 1, kind: input, shape index: {}]   ;;  %s449_s2 = inlined_call_operand.vmem [shape: f32[24,512], index: 2, kind: output, shape index: {}]  }
   0x1   :  { %317 = vset.pattern.permute.xlu1 %v346_v0  ;;  %316 = vset.pattern.permute.xlu0 %v346_v0  ;;  %v13_v1 = vld [vmem:[%s447_s0 + $0x10] sm:$0xff]  ;;  %v11_v2 = vld [vmem:[%s447_s0] sm:$0xff]  ;;  %v12_v3 = vld [vmem:[%s447_s0 + $0x8] sm:$0xff] }
   0x2   :  { %66 = vperm.xlu1 %317, %v13_v1   ;;  %56 = vperm.xlu0 %316, %v11_v2   ;;  %v19_v7 = vshrl.u32 %v18_v6, 7  ;;  %v14_v10 = vld [vmem:[%s448_s1] sm:$0x77]  ;;  %v15_v13 = vld [vmem:[%s448_s1 + $0x8] sm:$0x77] }
   0x4   :  { %v20_v8 = vsub.s32 0, %v19_v7  ;;  %v24_v9 = vsub.s32 4, %v19_v7  ;;  %v95_v11 = vsub.s32 1, %v19_v7  ;;  %v99_v12 = vsub.s32 5, %v19_v7 }
   0x5   :  { %v179_v14 = vsub.s32 2, %v19_v7  ;;  %v183_v15 = vsub.s32 6, %v19_v7 }
   0x6   :  { %318 = vset.pattern.permute.xlu1 %v347_v4  ;;  %61 = vperm.xlu0 %316, %v12_v3   ;;  %v21_v16 = vrot.slane %v14_v10, %v20_v8  ;;  %v25_v17 = vrot.slane %v14_v10, %v24_v9  ;;  %v29_v18 = vrot.slane %v15_v13, %v20_v8 }
   0x7   :  { %130 = vperm.xlu1 %318, %v11_v2   ;;  %v33_v19 = vrot.slane %v15_v13, %v24_v9  ;;  %v96_v20 = vrot.slane %v14_v10, %v95_v11  ;;  %v100_v21 = vrot.slane %v14_v10, %v99_v12  ;;  %v104_v22 = vrot.slane %v15_v13, %v95_v11 }
   0x8   :  { %v108_v23 = vrot.slane %v15_v13, %v99_v12  ;;  %v180_v24 = vrot.slane %v14_v10, %v179_v14  ;;  %v184_v25 = vrot.slane %v14_v10, %v183_v15  ;;  %v188_v26 = vrot.slane %v15_v13, %v179_v14 }
   0x9   :  { %v192_v27 = vrot.slane %v15_v13, %v183_v15  ;;  %v41_v28 = vrot.slane %v21_v16, %v20_v8  ;;  %v45_v29 = vrot.slane %v25_v17, %v20_v8  ;;  %v49_v30 = vrot.slane %v29_v18, %v20_v8 }
   0xa   :  { %319 = vset.pattern.permute.xlu0 %v347_v4  ;;  %v53_v31 = vrot.slane %v33_v19, %v20_v8  ;;  %v116_v34 = vrot.slane %v96_v20, %v95_v11  ;;  %v120_v35 = vrot.slane %v100_v21, %v95_v11  ;;  %v124_v36 = vrot.slane %v104_v22, %v95_v11 }
   0xb   :  { %138 = vperm.xlu1 %318, %v13_v1   ;;  %134 = vperm.xlu0 %319, %v12_v3   ;;  %v128_v37 = vrot.slane %v108_v23, %v95_v11  ;;  %v379_v38 = vrot.slane %v180_v24, %v179_v14  ;;  %v381_v39 = vrot.slane %v184_v25, %v179_v14 }
   0xc   :  { %v383_v42 = vrot.slane %v188_v26, %v179_v14  ;;  %v385_v43 = vrot.slane %v192_v27, %v179_v14 }
   0xf   :  { %320 = vset.pattern.permute.xlu1 %v348_v5  ;;  %321 = vset.pattern.permute.xlu0 %v348_v5 }
  0x10   :  { %214 = vperm.xlu1 %320, %v11_v2   ;;  %218 = vperm.xlu0 %321, %v12_v3  }
  0x14   :  { %222 = vperm.xlu1 %320, %v13_v1  }
  0x81   :  { %v67_v32 = vpop.permute.xlu1 %66  ;;  %v57_v33 = vpop.permute.xlu0 %56 }
  0x82   :  { %v69_v40 = vsub.f32 %v41_v28, %v57_v33  ;;  %v70_v41 = vsub.f32 %v45_v29, %v57_v33  ;;  %v77_v44 = vsub.f32 %v41_v28, %v67_v32  ;;  %v78_v45 = vsub.f32 %v45_v29, %v67_v32 }
  0x83   :  { %v71_v46 = vsub.f32 %v49_v30, %v57_v33  ;;  %v72_v47 = vsub.f32 %v53_v31, %v57_v33  ;;  %v79_v48 = vsub.f32 %v49_v30, %v67_v32  ;;  %v80_v49 = vsub.f32 %v53_v31, %v67_v32 }
  0x84   :  { %v81_v50 = vmul.f32 %v69_v40, %v69_v40  ;;  %v82_v51 = vmul.f32 %v70_v41, %v70_v41  ;;  %v387_v62 = vmul.f32 %v77_v44, %v77_v44  ;;  %v389_v63 = vmul.f32 %v78_v45, %v78_v45 }
  0x85   :  { %v62_v52 = vpop.permute.xlu0 %61  ;;  %v83_v0 = vmul.f32 %v71_v46, %v71_v46  ;;  %v84_v1 = vmul.f32 %v72_v47, %v72_v47  ;;  %v391_v6 = vmul.f32 %v79_v48, %v79_v48  ;;  %v393_v7 = vmul.f32 %v80_v49, %v80_v49 }
  0x86   :  { %v73_v53 = vsub.f32 %v41_v28, %v62_v52  ;;  %v74_v54 = vsub.f32 %v45_v29, %v62_v52  ;;  %v75_v55 = vsub.f32 %v49_v30, %v62_v52  ;;  %v76_v56 = vsub.f32 %v53_v31, %v62_v52  ;;  %v131_v57 = vpop.permute.xlu1 %130 }
  0x87   :  { %v141_v58 = vsub.f32 %v116_v34, %v131_v57  ;;  %v142_v59 = vsub.f32 %v120_v35, %v131_v57  ;;  %v143_v60 = vsub.f32 %v124_v36, %v131_v57  ;;  %v144_v61 = vsub.f32 %v128_v37, %v131_v57 }
  0x88   :  { %v85_v8 = vmul.f32 %v73_v53, %v73_v53  ;;  %v86_v9 = vmul.f32 %v74_v54, %v74_v54  ;;  %v87_v12 = vmul.f32 %v75_v55, %v75_v55  ;;  %v88_v13 = vmul.f32 %v76_v56, %v76_v56 }
  0x89   :  { %v153_v2 = vmul.f32 %v141_v58, %v141_v58  ;;  %v154_v3 = vmul.f32 %v142_v59, %v142_v59  ;;  %v155_v4 = vmul.f32 %v143_v60, %v143_v60  ;;  %v156_v5 = vmul.f32 %v144_v61, %v144_v61 }
  0x8a   :  { %v139_v10 = vpop.permute.xlu1 %138  ;;  %v135_v11 = vpop.permute.xlu0 %134 }
  0x8b   :  { %v165_v14 = vadd.f32 %v153_v2, %v81_v50  ;;  %v166_v15 = vadd.f32 %v154_v3, %v82_v51  ;;  %v167_v16 = vadd.f32 %v155_v4, %v83_v0  ;;  %v168_v17 = vadd.f32 %v156_v5, %v84_v1 }
  0x8c   :  { %v149_v18 = vsub.f32 %v116_v34, %v139_v10  ;;  %v150_v19 = vsub.f32 %v120_v35, %v139_v10  ;;  %v145_v20 = vsub.f32 %v116_v34, %v135_v11  ;;  %v146_v21 = vsub.f32 %v120_v35, %v135_v11 }
  0x8d   :  { %v147_v22 = vsub.f32 %v124_v36, %v135_v11  ;;  %v148_v23 = vsub.f32 %v128_v37, %v135_v11  ;;  %v151_v24 = vsub.f32 %v124_v36, %v139_v10  ;;  %v152_v25 = vsub.f32 %v128_v37, %v139_v10 }
  0x8e   :  { %v161_v26 = vmul.f32 %v149_v18, %v149_v18  ;;  %v162_v27 = vmul.f32 %v150_v19, %v150_v19  ;;  %v157_v28 = vmul.f32 %v145_v20, %v145_v20  ;;  %v158_v29 = vmul.f32 %v146_v21, %v146_v21 }
  0x8f   :  { %v159_v30 = vmul.f32 %v147_v22, %v147_v22  ;;  %v160_v31 = vmul.f32 %v148_v23, %v148_v23  ;;  %v215_v32 = vpop.permute.xlu1 %214  ;;  %v219_v35 = vpop.permute.xlu0 %218  ;;  %v163_v10 = vmul.f32 %v151_v24, %v151_v24  ;;  %v164_v19 = vmul.f32 %v152_v25, %v152_v25 }
  0x90   :  { %v225_v33 = vsub.f32 %v379_v38, %v215_v32  ;;  %v226_v40 = vsub.f32 %v381_v39, %v215_v32  ;;  %v227_v41 = vsub.f32 %v383_v42, %v215_v32  ;;  %v228_v34 = vsub.f32 %v385_v43, %v215_v32 }
  0x91   :  { %v169_v44 = vadd.f32 %v157_v28, %v85_v8  ;;  %v170_v45 = vadd.f32 %v158_v29, %v86_v9  ;;  %v171_v36 = vadd.f32 %v159_v30, %v87_v12  ;;  %v172_v37 = vadd.f32 %v160_v31, %v88_v13 }
  0x92   :  { %v237_v46 = vmul.f32 %v225_v33, %v225_v33  ;;  %v238_v47 = vmul.f32 %v226_v40, %v226_v40  ;;  %v239_v48 = vmul.f32 %v227_v41, %v227_v41  ;;  %v240_v49 = vmul.f32 %v228_v34, %v228_v34 }
  0x93   :  { %v229_v50 = vsub.f32 %v379_v38, %v219_v35  ;;  %v230_v51 = vsub.f32 %v381_v39, %v219_v35  ;;  %v231_v52 = vsub.f32 %v383_v42, %v219_v35  ;;  %v232_v53 = vsub.f32 %v385_v43, %v219_v35  ;;  %v223_v18 = vpop.permute.xlu1 %222 }
  0x94   :  { %v249_v54 = vadd.f32 %v237_v46, %v165_v14  ;;  %v250_v55 = vadd.f32 %v238_v47, %v166_v15  ;;  %v251_v56 = vadd.f32 %v239_v48, %v167_v16  ;;  %v252_v57 = vadd.f32 %v240_v49, %v168_v17 }
  0x95   :  { %v241_v58 = vmul.f32 %v229_v50, %v229_v50  ;;  %v242_v59 = vmul.f32 %v230_v51, %v230_v51  ;;  %v243_v60 = vmul.f32 %v231_v52, %v231_v52  ;;  %v244_v61 = vmul.f32 %v232_v53, %v232_v53 }
  0x96   :  { %v261_v0 = vsub.f32 0.0, %v249_v54  ;;  %v262_v1 = vsub.f32 0.0, %v250_v55  ;;  %v263_v2 = vsub.f32 0.0, %v251_v56  ;;  %v264_v3 = vsub.f32 0.0, %v252_v57 }
  0x97   :  { %v253_v4 = vadd.f32 %v241_v58, %v169_v44  ;;  %v254_v5 = vadd.f32 %v242_v59, %v170_v45  ;;  %v255_v8 = vadd.f32 %v243_v60, %v171_v36  ;;  %v256_v9 = vadd.f32 %v244_v61, %v172_v37 }
  0x98   :  { %v273_v11 = vmul.f32 1.442695, %v261_v0  ;;  %v275_v12 = vmul.f32 1.442695, %v262_v1  ;;  %v277_v13 = vmul.f32 1.442695, %v263_v2  ;;  %v173_v21 = vadd.f32 %v161_v26, %v387_v62 }
  0x99   :  { %v279_v14 = vmul.f32 1.442695, %v264_v3  ;;  %v265_v15 = vsub.f32 0.0, %v253_v4  ;;  %v266_v16 = vsub.f32 0.0, %v254_v5  ;;  %v267_v17 = vsub.f32 0.0, %v255_v8 }
  0x9a   :  { %322 = vpow2.f32 %v273_v11  ;;  %v268_v20 = vsub.f32 0.0, %v256_v9  ;;  %v174_v28 = vadd.f32 %v162_v27, %v389_v63  ;;  %v233_v30 = vsub.f32 %v379_v38, %v223_v18 }
  0x9b   :  { %324 = vpow2.f32 %v275_v12  ;;  %v281_v22 = vmul.f32 1.442695, %v265_v15  ;;  %v283_v23 = vmul.f32 1.442695, %v266_v16  ;;  %v285_v24 = vmul.f32 1.442695, %v267_v17 }
  0x9c   :  { %326 = vpow2.f32 %v277_v13  ;;  %v287_v29 = vmul.f32 1.442695, %v268_v20  ;;  %v234_v31 = vsub.f32 %v381_v39, %v223_v18  ;;  %v235_v32 = vsub.f32 %v383_v42, %v223_v18 }
  0x9d   :  { %328 = vpow2.f32 %v279_v14  ;;  %v236_v25 = vsub.f32 %v385_v43, %v223_v18  ;;  %v175_v62 = vadd.f32 %v163_v10, %v391_v6  ;;  %v176_v26 = vadd.f32 %v164_v19, %v393_v7 }
  0x9e   :  { %330 = vpow2.f32 %v281_v22  ;;  %v245_v33 = vmul.f32 %v233_v30, %v233_v30  ;;  %v246_v63 = vmul.f32 %v234_v31, %v234_v31  ;;  %v247_v27 = vmul.f32 %v235_v32, %v235_v32 }
  0x9f   :  { %332 = vpow2.f32 %v283_v23  ;;  %v248_v40 = vmul.f32 %v236_v25, %v236_v25 }
  0xa0   :  { %334 = vpow2.f32 %v285_v24  ;;  %v257_v41 = vadd.f32 %v245_v33, %v173_v21  ;;  %v258_v38 = vadd.f32 %v246_v63, %v174_v28  ;;  %v259_v34 = vadd.f32 %v247_v27, %v175_v62 }
  0xa1   :  { %336 = vpow2.f32 %v287_v29  ;;  %v260_v39 = vadd.f32 %v248_v40, %v176_v26 }
  0xa2   :  { %v269_v35 = vsub.f32 0.0, %v257_v41  ;;  %v270_v42 = vsub.f32 0.0, %v258_v38  ;;  %v271_v44 = vsub.f32 0.0, %v259_v34 }
  0xa3   :  { %v272_v43 = vsub.f32 0.0, %v260_v39 }
  0xa4   :  { %v323_v45 = vpop.eup %322  ;;  %v289_v36 = vmul.f32 1.442695, %v269_v35  ;;  %v291_v7 = vmul.f32 1.442695, %v270_v42  ;;  %v293_v37 = vmul.f32 1.442695, %v271_v44 }
  0xa5   :  { %v325_v6 = vpop.eup %324  ;;  %297 = vst [vmem:[%s449_s2] sm:$0xff] %v323_v45  ;;  %v295_v46 = vmul.f32 1.442695, %v272_v43 }
  0xa6   :  { %v327_v47 = vpop.eup %326  ;;  %298 = vst [vmem:[%s449_s2 + $0x8] sm:$0xff] %v325_v6  ;;  %338 = vpow2.f32 %v289_v36 }
  0xa7   :  { %v329_v48 = vpop.eup %328  ;;  %299 = vst [vmem:[%s449_s2 + $0x10] sm:$0xff] %v327_v47  ;;  %340 = vpow2.f32 %v291_v7 }
  0xa8   :  { %v331_v49 = vpop.eup %330  ;;  %300 = vst [vmem:[%s449_s2 + $0x18] sm:$0xff] %v329_v48  ;;  %342 = vpow2.f32 %v293_v37 }
  0xa9   :  { %v333_v50 = vpop.eup %332  ;;  %301 = vst [vmem:[%s449_s2 + $0x20] sm:$0xff] %v331_v49  ;;  %344 = vpow2.f32 %v295_v46 }
  0xaa   :  { %v335_v51 = vpop.eup %334  ;;  %302 = vst [vmem:[%s449_s2 + $0x28] sm:$0xff] %v333_v50 }
  0xab   :  { %v337_v52 = vpop.eup %336  ;;  %303 = vst [vmem:[%s449_s2 + $0x30] sm:$0xff] %v335_v51 }
  0xac   :  { %304 = vst [vmem:[%s449_s2 + $0x38] sm:$0xff] %v337_v52 }
  0xb0   :  { %v339_v53 = vpop.eup %338 }
  0xb1   :  { %v341_v54 = vpop.eup %340  ;;  %305 = vst [vmem:[%s449_s2 + $0x40] sm:$0xff] %v339_v53 }
  0xb2   :  { %v343_v55 = vpop.eup %342  ;;  %306 = vst [vmem:[%s449_s2 + $0x48] sm:$0xff] %v341_v54 }
  0xb3   :  { %v345_v56 = vpop.eup %344  ;;  %307 = vst [vmem:[%s449_s2 + $0x50] sm:$0xff] %v343_v55 }
  0xb4   :  { %308 = vst [vmem:[%s449_s2 + $0x58] sm:$0xff] %v345_v56 }

</bundles_post_ra>
